<compile_context>
chip_gen: v6e
topology: v6e:2x2x1
jax: 0.10.0
libtpu: 0.0.40
codegen_flags: <defaults>
</compile_context>

<pallas_src>
import math

import jax
import jax.numpy as jnp
from jax.experimental import pallas as pl
from jax.experimental.pallas import tpu as pltpu


def make_mha_kernel(embed_size: int, nhead: int, compute_dtype, share_kv: bool,
                    want_attn: bool):
    E, H = embed_size, nhead
    hd = E // H

    def core(q_ref, k_ref, v_ref, bias_ref, wqkv_ref, bqkv_ref, wo_ref, bo_ref,
             out_ref, attn_ref):
        q = q_ref[0]                 # (tq, E) compute dtype
        k = k_ref[0]                 # (L,  E)
        v = v_ref[0]                 # (L,  E)  (same ref as k when share_kv)
        bias = bias_ref[0, 0]        # (tq, L) f32 additive mask (0 / -1e10)

        # Lane-dense 2-D projections on the MXU, f32 accumulation.
        # wqkv_ref[0] already carries the 1/sqrt(head_dim) scale.
        Q2 = jnp.dot(q, wqkv_ref[0], preferred_element_type=jnp.float32) + bqkv_ref[0]
        K2 = jnp.dot(k, wqkv_ref[1], preferred_element_type=jnp.float32) + bqkv_ref[1]
        V2 = jnp.dot(v, wqkv_ref[2], preferred_element_type=jnp.float32) + bqkv_ref[2]

        Qc = Q2.astype(compute_dtype)
        Kc = K2.astype(compute_dtype)
        Vc = V2.astype(compute_dtype)

        out = None
        for h in range(H):           # static unroll; H is small
            sl = slice(h * hd, (h + 1) * hd)

            # energy_h = Q_h K_h^T (scale already folded) — last-dim contraction,
            # no explicit transpose; additive mask instead of compare+select.
            eh = jnp.einsum('qd,kd->qk', Qc[:, sl], Kc[:, sl],
                            preferred_element_type=jnp.float32)      # (tq, L) f32
            eh = eh + bias

            # Softmax in f32; reciprocal on the (otherwise idle) EUP slot, plus one
            # Newton-Raphson step for near-exact row sums.
            m = jnp.max(eh, axis=-1, keepdims=True)
            e = jnp.exp(eh - m)
            l = jnp.sum(e, axis=-1, keepdims=True)
            r = pl.reciprocal(l, approx=True)
            r = r * (2.0 - l * r)
            p = e * r                                                # (tq, L) f32

            if attn_ref is not None:
                attn_ref[0, h] = p.astype(attn_ref.dtype)

            ctx = jnp.dot(p.astype(compute_dtype), Vc[:, sl],
                          preferred_element_type=jnp.float32)        # (tq, hd)

            # fc_o with the head reduction fused into the running f32 accumulator:
            #   concat_h(ctx_h) @ Wo^T == sum_h ctx_h @ Wo^T[h*hd:(h+1)*hd, :]
            contrib = jnp.dot(ctx.astype(compute_dtype), wo_ref[h],
                              preferred_element_type=jnp.float32)    # (tq, E)
            out = contrib if out is None else out + contrib

        out_ref[0] = (out + bo_ref[...]).astype(out_ref.dtype)

    # Explicit-arity wrappers (refs depend on the share_kv / want_attn configuration).
    if share_kv and want_attn:
        def kernel(q_ref, kv_ref, bias_ref, wqkv_ref, bqkv_ref, wo_ref, bo_ref,
                   out_ref, attn_ref):
            core(q_ref, kv_ref, kv_ref, bias_ref, wqkv_ref, bqkv_ref, wo_ref, bo_ref,
                 out_ref, attn_ref)
    elif share_kv:
        def kernel(q_ref, kv_ref, bias_ref, wqkv_ref, bqkv_ref, wo_ref, bo_ref,
                   out_ref):
            core(q_ref, kv_ref, kv_ref, bias_ref, wqkv_ref, bqkv_ref, wo_ref, bo_ref,
                 out_ref, None)
    elif want_attn:
        def kernel(q_ref, k_ref, v_ref, bias_ref, wqkv_ref, bqkv_ref, wo_ref, bo_ref,
                   out_ref, attn_ref):
            core(q_ref, k_ref, v_ref, bias_ref, wqkv_ref, bqkv_ref, wo_ref, bo_ref,
                 out_ref, attn_ref)
    else:
        def kernel(q_ref, k_ref, v_ref, bias_ref, wqkv_ref, bqkv_ref, wo_ref, bo_ref,
                   out_ref):
            core(q_ref, k_ref, v_ref, bias_ref, wqkv_ref, bqkv_ref, wo_ref, bo_ref,
                 out_ref, None)

    return kernel


def _device_defaults():
    """Generation-specific (q_tile, vmem_limit_bytes)."""
    kind = ""
    try:
        kind = jax.devices()[0].device_kind.lower()
    except Exception:
        pass
    if ("v5e" in kind) or ("v5 lite" in kind) or ("v5lite" in kind):
        return 128, 96 * 1024 * 1024          # v5e: 128-wide MXU, 128 MiB VMEM
    if "v7" in kind:
        return 256, 48 * 1024 * 1024          # v7x: 256-wide MXU, 64 MiB VMEM per TC
    return 256, 96 * 1024 * 1024              # v6e and default


def _prepare_kernel_params(params, embed_size, nhead, compute_dtype):
    """Host-side: transpose to (in, out), fold 1/sqrt(hd), merge QKV into one operand."""
    E, H = embed_size, nhead
    hd = E // H
    inv_scale = 1.0 / math.sqrt(float(hd))

    wq = jnp.transpose(params["wq"]) * inv_scale          # (E, E): x @ wq == fc_q(x)/sqrt(hd)
    wk = jnp.transpose(params["wk"])
    wv = jnp.transpose(params["wv"])
    w_qkv = jnp.stack([wq, wk, wv], axis=0).astype(compute_dtype)   # (3, E, E)

    bq = params["bq"].reshape(1, E).astype(jnp.float32) * inv_scale
    bk = params["bk"].reshape(1, E).astype(jnp.float32)
    bv = params["bv"].reshape(1, E).astype(jnp.float32)
    b_qkv = jnp.stack([bq, bk, bv], axis=0)                          # (3, 1, E) f32

    # fc_o: concat_h(ctx_h) @ Wo^T + bo == sum_h ctx_h @ Wo^T[h*hd:(h+1)*hd, :] + bo
    wo3 = jnp.transpose(params["wo"]).reshape(H, hd, E).astype(compute_dtype)
    bo = params["bo"].reshape(1, E).astype(jnp.float32)
    return w_qkv, b_qkv, wo3, bo


def multi_head_attention(query, key, value, inputs_mask, params, *,
                         embed_size, nhead, compute_dtype=jnp.float32,
                         q_tile=None, return_attn=True, attn_dtype=jnp.float32,
                         vmem_limit_bytes=None):
    """query/key/value: [B, L, E]; inputs_mask: [B, 1, L, L] or None.

    Returns (out, attention_prob) like the PyTorch module; attention_prob is None
    when return_attn=False (saves the O(L^2) HBM store for inference).
    """
    B, L, E = query.shape
    assert E == embed_size and E % nhead == 0
    hd = E // nhead

    share_kv = key is value

    dflt_tile, dflt_vmem = _device_defaults()
    if q_tile is None:
        q_tile = dflt_tile
    if vmem_limit_bytes is None:
        vmem_limit_bytes = dflt_vmem

    # Query-tile size: multiple of 8 that divides L, else a single full tile.
    tq = min(q_tile, L)
    if L % tq != 0:
        tq = L
    n_qt = L // tq

    # Additive mask bias (0 where attended, -1e10 where masked), computed once on host.
    if inputs_mask is None:
        mask_bias = jnp.zeros((B, 1, L, L), jnp.float32)
    else:
        mask_bias = jnp.where(inputs_mask == 0, jnp.float32(-1e10), jnp.float32(0.0))

    w_qkv, b_qkv, wo3, bo = _prepare_kernel_params(params, E, nhead, compute_dtype)
    qc = query.astype(compute_dtype)
    kc = key.astype(compute_dtype)
    vc = value.astype(compute_dtype)

    # Grid: longer axis first so megacore "parallel" sharding (v7x: 2 TCs) stays balanced.
    if n_qt > B:
        grid = (n_qt, B)

        def _bq(g0, g1):
            return g1, g0
    else:
        grid = (B, n_qt)

        def _bq(g0, g1):
            return g0, g1

    def q_map(g0, g1):
        b, qi = _bq(g0, g1); return (b, qi, 0)

    def kv_map(g0, g1):
        b, qi = _bq(g0, g1); return (b, 0, 0)

    def bias_map(g0, g1):
        b, qi = _bq(g0, g1); return (b, 0, qi, 0)

    def out_map(g0, g1):
        b, qi = _bq(g0, g1); return (b, qi, 0)

    def attn_map(g0, g1):
        b, qi = _bq(g0, g1); return (b, 0, qi, 0)

    def const3(g0, g1):
        return (0, 0, 0)

    def const2(g0, g1):
        return (0, 0)

    q_spec = pl.BlockSpec((1, tq, E), q_map)
    kv_spec = pl.BlockSpec((1, L, E), kv_map)
    bias_spec = pl.BlockSpec((1, 1, tq, L), bias_map)
    wqkv_spec = pl.BlockSpec((3, E, E), const3)
    bqkv_spec = pl.BlockSpec((3, 1, E), const3)
    wo_spec = pl.BlockSpec((nhead, hd, E), const3)
    bo_spec = pl.BlockSpec((1, E), const2)

    in_specs = [q_spec]
    inputs = [qc]
    if share_kv:
        in_specs.append(kv_spec)
        inputs.append(kc)
    else:
        in_specs += [kv_spec, kv_spec]
        inputs += [kc, vc]
    in_specs += [bias_spec, wqkv_spec, bqkv_spec, wo_spec, bo_spec]
    inputs += [mask_bias, w_qkv, b_qkv, wo3, bo]

    out_spec = pl.BlockSpec((1, tq, E), out_map)
    if return_attn:
        out_shape = (jax.ShapeDtypeStruct((B, L, E), jnp.float32),
                     jax.ShapeDtypeStruct((B, nhead, L, L), attn_dtype))
        out_specs = (out_spec, pl.BlockSpec((1, nhead, tq, L), attn_map))
    else:
        out_shape = jax.ShapeDtypeStruct((B, L, E), jnp.float32)
        out_specs = out_spec

    kernel = make_mha_kernel(E, nhead, compute_dtype, share_kv, return_attn)

    fn = pl.pallas_call(
        kernel,
        out_shape=out_shape,
        grid_spec=pltpu.PrefetchScalarGridSpec(
            num_scalar_prefetch=0,
            grid=grid,
            in_specs=in_specs,
            out_specs=out_specs),
        compiler_params=pltpu.CompilerParams(
            dimension_semantics=("parallel", "parallel"),
            vmem_limit_bytes=vmem_limit_bytes),
    )
    result = fn(*inputs)
    if return_attn:
        out, attn = result
        return out, attn
    return result, None


def init_params(key, embed_size):
    """Deterministic parameter init matching nn.Linear(embed, embed) shapes (W: out x in)."""
    ks = jax.random.split(key, 8)
    bound = 1.0 / math.sqrt(embed_size)

    def lin(kw, kb):
        w = jax.random.uniform(kw, (embed_size, embed_size), jnp.float32, -bound, bound)
        b = jax.random.uniform(kb, (1, embed_size), jnp.float32, -bound, bound)
        return w, b

    wq, bq = lin(ks[0], ks[1])
    wk, bk = lin(ks[2], ks[3])
    wv, bv = lin(ks[4], ks[5])
    wo, bo = lin(ks[6], ks[7])
    return dict(wq=wq, bq=bq, wk=wk, bk=bk, wv=wv, bv=bv, wo=wo, bo=bo)


def reference(query, key, value, mask, params, *, embed_size, nhead):
    """Pure-JAX reference (PyTorch layout weights) for sanity checking."""
    B, L, E = query.shape
    hd = embed_size // nhead
    scale = math.sqrt(float(hd))

    def lin(x, w, b):
        return x @ w.T + b[0]

    Q = lin(query, params["wq"], params["bq"]).reshape(B, L, nhead, hd).transpose(0, 2, 1, 3)
    K = lin(key,   params["wk"], params["bk"]).reshape(B, L, nhead, hd).transpose(0, 2, 1, 3)
    V = lin(value, params["wv"], params["bv"]).reshape(B, L, nhead, hd).transpose(0, 2, 1, 3)
    energy = jnp.einsum("bhqd,bhkd->bhqk", Q, K) / scale
    if mask is not None:
        energy = jnp.where(mask == 0, -1e10, energy)
    p = jax.nn.softmax(energy, axis=-1)
    out = jnp.einsum("bhqk,bhkd->bhqd", p, V).transpose(0, 2, 1, 3).reshape(B, L, E)
    out = lin(out, params["wo"], params["bo"])
    return out, p


if __name__ == "__main__":
    B, L, E, H = 2, 8, 32, 4  # batch, max_len, embed_size, nhead

    key = jax.random.PRNGKey(0)
    k_q, k_k, k_v, k_p = jax.random.split(key, 4)

    query = jax.random.normal(k_q, (B, L, E), jnp.float32)
    key_in = jax.random.normal(k_k, (B, L, E), jnp.float32)
    value = jax.random.normal(k_v, (B, L, E), jnp.float32)

    # Padding-style mask: batch 0 attends to all 8 positions, batch 1 to first 6.
    lengths = jnp.array([8, 6], dtype=jnp.int32)
    pos = jnp.arange(L)
    key_valid = (pos[None, :] < lengths[:, None]).astype(jnp.int32)       # [B, L]
    inputs_mask = (key_valid[:, None, None, :]
                   * jnp.ones((B, 1, L, 1), jnp.int32))                   # [B, 1, L, L]

    params = init_params(k_p, E)
    out_ref, attn_ref = reference(query, key_in, value, inputs_mask, params,
                                  embed_size=E, nhead=H)

    # 1) f32 compute path, distinct q/k/v, attention map returned.
    out, attn = multi_head_attention(query, key_in, value, inputs_mask, params,
                                     embed_size=E, nhead=H,
                                     compute_dtype=jnp.float32)
    jax.block_until_ready((out, attn))
    assert out.shape == (B, L, E) and attn.shape == (B, H, L, L)
    assert jnp.allclose(out, out_ref, atol=1e-2, rtol=1e-2)
    assert jnp.allclose(attn, attn_ref, atol=1e-2, rtol=1e-2)

    # 2) bf16 matmul path (f32 accumulation / f32 softmax), bf16 attention map.
    out16, attn16 = multi_head_attention(query, key_in, value, inputs_mask, params,
                                         embed_size=E, nhead=H,
                                         compute_dtype=jnp.bfloat16,
                                         attn_dtype=jnp.bfloat16)
    jax.block_until_ready((out16, attn16))
    assert jnp.allclose(out16, out_ref, atol=5e-2, rtol=5e-2)
    assert jnp.allclose(attn16.astype(jnp.float32), attn_ref, atol=5e-2, rtol=5e-2)

    # 3) Self-attention path: key is value -> the (L, E) tensor is DMA'd once.
    out_sa_ref, attn_sa_ref = reference(query, query, query, inputs_mask, params,
                                        embed_size=E, nhead=H)
    out_sa, attn_sa = multi_head_attention(query, query, query, inputs_mask, params,
                                           embed_size=E, nhead=H,
                                           compute_dtype=jnp.float32)
    jax.block_until_ready((out_sa, attn_sa))
    assert jnp.allclose(out_sa, out_sa_ref, atol=1e-2, rtol=1e-2)
    assert jnp.allclose(attn_sa, attn_sa_ref, atol=1e-2, rtol=1e-2)

    # 4) Inference path: no attention-map HBM writeback.
    out_na, attn_na = multi_head_attention(query, key_in, value, inputs_mask, params,
                                           embed_size=E, nhead=H, return_attn=False)
    jax.block_until_ready(out_na)
    assert attn_na is None
    assert jnp.allclose(out_na, out_ref, atol=1e-2, rtol=1e-2)

    print("KERNEL_OK")
</pallas_src>

<mosaic_0001>
module attributes {stable_mosaic.version = 11 : i64} {
  func.func @kernel(%arg0: i32, %arg1: i32, %arg2: memref<1x8x32xf32, #tpu.memory_space<vmem>>, %arg3: memref<1x8x32xf32, #tpu.memory_space<vmem>>, %arg4: memref<1x8x32xf32, #tpu.memory_space<vmem>>, %arg5: memref<1x1x8x8xf32, #tpu.memory_space<vmem>>, %arg6: memref<3x32x32xf32, #tpu.memory_space<vmem>>, %arg7: memref<3x1x32xf32, #tpu.memory_space<vmem>>, %arg8: memref<4x8x32xf32, #tpu.memory_space<vmem>>, %arg9: memref<1x32xf32, #tpu.memory_space<vmem>>, %arg10: memref<1x8x32xf32, #tpu.memory_space<vmem>>, %arg11: memref<1x4x8x8xf32, #tpu.memory_space<vmem>>) attributes {dimension_semantics = [#tpu.dimension_semantics<parallel>, #tpu.dimension_semantics<parallel>], iteration_bounds = array<i64: 2, 1>, scalar_prefetch = 0 : i64, scratch_operands = 0 : i64, tpu.core_type = #tpu.core_type<tc>, window_params = [{transform_indices = @transform_0, window_bounds = array<i64: 1, 8, 32>}, {transform_indices = @transform_1, window_bounds = array<i64: 1, 8, 32>}, {transform_indices = @transform_2, window_bounds = array<i64: 1, 8, 32>}, {transform_indices = @transform_3, window_bounds = array<i64: 1, 1, 8, 8>}, {pipeline_mode = #tpu.pipeline_mode<synchronous>, transform_indices = @transform_4, window_bounds = array<i64: 3, 32, 32>}, {pipeline_mode = #tpu.pipeline_mode<synchronous>, transform_indices = @transform_5, window_bounds = array<i64: 3, 1, 32>}, {pipeline_mode = #tpu.pipeline_mode<synchronous>, transform_indices = @transform_6, window_bounds = array<i64: 4, 8, 32>}, {pipeline_mode = #tpu.pipeline_mode<synchronous>, transform_indices = @transform_7, window_bounds = array<i64: 1, 32>}, {transform_indices = @transform_8, window_bounds = array<i64: 1, 8, 32>}, {transform_indices = @transform_9, window_bounds = array<i64: 1, 4, 8, 8>}]} {
    %c0 = arith.constant 0 : index
    %c0_0 = arith.constant 0 : index
    %c0_1 = arith.constant 0 : index
    %0 = vector.load %arg2[%c0, %c0_0, %c0_1] : memref<1x8x32xf32, #tpu.memory_space<vmem>>, vector<1x8x32xf32>
    %1 = vector.shape_cast %0 : vector<1x8x32xf32> to vector<8x32xf32>
    %c0_2 = arith.constant 0 : index
    %c0_3 = arith.constant 0 : index
    %c0_4 = arith.constant 0 : index
    %2 = vector.load %arg3[%c0_2, %c0_3, %c0_4] : memref<1x8x32xf32, #tpu.memory_space<vmem>>, vector<1x8x32xf32>
    %3 = vector.shape_cast %2 : vector<1x8x32xf32> to vector<8x32xf32>
    %c0_5 = arith.constant 0 : index
    %c0_6 = arith.constant 0 : index
    %c0_7 = arith.constant 0 : index
    %4 = vector.load %arg4[%c0_5, %c0_6, %c0_7] : memref<1x8x32xf32, #tpu.memory_space<vmem>>, vector<1x8x32xf32>
    %5 = vector.shape_cast %4 : vector<1x8x32xf32> to vector<8x32xf32>
    %c0_8 = arith.constant 0 : index
    %c0_9 = arith.constant 0 : index
    %c0_10 = arith.constant 0 : index
    %c0_11 = arith.constant 0 : index
    %6 = vector.load %arg5[%c0_8, %c0_9, %c0_10, %c0_11] : memref<1x1x8x8xf32, #tpu.memory_space<vmem>>, vector<1x1x8x8xf32>
    %7 = vector.shape_cast %6 : vector<1x1x8x8xf32> to vector<8x8xf32>
    %c0_12 = arith.constant 0 : index
    %c0_13 = arith.constant 0 : index
    %c0_14 = arith.constant 0 : index
    %8 = vector.load %arg6[%c0_12, %c0_13, %c0_14] : memref<3x32x32xf32, #tpu.memory_space<vmem>>, vector<1x32x32xf32>
    %9 = vector.shape_cast %8 : vector<1x32x32xf32> to vector<32x32xf32>
    %cst = arith.constant dense<0.000000e+00> : vector<8x32xf32>
    %10 = tpu.matmul %1, %9, %cst {dimension_numbers = #tpu.dot_dimension_numbers<[1], [0], [0], [1], [0, 0, 1, 1], [], []>} : vector<8x32xf32>, vector<32x32xf32>, vector<8x32xf32> -> vector<8x32xf32>
    %c0_15 = arith.constant 0 : index
    %c0_16 = arith.constant 0 : index
    %c0_17 = arith.constant 0 : index
    %11 = vector.load %arg7[%c0_15, %c0_16, %c0_17] : memref<3x1x32xf32, #tpu.memory_space<vmem>>, vector<1x1x32xf32>
    %12 = vector.shape_cast %11 : vector<1x1x32xf32> to vector<1x32xf32>
    %13 = vector.broadcast %12 : vector<1x32xf32> to vector<8x32xf32>
    %14 = arith.addf %10, %13 : vector<8x32xf32>
    %c1 = arith.constant 1 : index
    %c0_18 = arith.constant 0 : index
    %c0_19 = arith.constant 0 : index
    %15 = vector.load %arg6[%c1, %c0_18, %c0_19] : memref<3x32x32xf32, #tpu.memory_space<vmem>>, vector<1x32x32xf32>
    %16 = vector.shape_cast %15 : vector<1x32x32xf32> to vector<32x32xf32>
    %cst_20 = arith.constant dense<0.000000e+00> : vector<8x32xf32>
    %17 = tpu.matmul %3, %16, %cst_20 {dimension_numbers = #tpu.dot_dimension_numbers<[1], [0], [0], [1], [0, 0, 1, 1], [], []>} : vector<8x32xf32>, vector<32x32xf32>, vector<8x32xf32> -> vector<8x32xf32>
    %c1_21 = arith.constant 1 : index
    %c0_22 = arith.constant 0 : index
    %c0_23 = arith.constant 0 : index
    %18 = vector.load %arg7[%c1_21, %c0_22, %c0_23] : memref<3x1x32xf32, #tpu.memory_space<vmem>>, vector<1x1x32xf32>
    %19 = vector.shape_cast %18 : vector<1x1x32xf32> to vector<1x32xf32>
    %20 = vector.broadcast %19 : vector<1x32xf32> to vector<8x32xf32>
    %21 = arith.addf %17, %20 : vector<8x32xf32>
    %c2 = arith.constant 2 : index
    %c0_24 = arith.constant 0 : index
    %c0_25 = arith.constant 0 : index
    %22 = vector.load %arg6[%c2, %c0_24, %c0_25] : memref<3x32x32xf32, #tpu.memory_space<vmem>>, vector<1x32x32xf32>
    %23 = vector.shape_cast %22 : vector<1x32x32xf32> to vector<32x32xf32>
    %cst_26 = arith.constant dense<0.000000e+00> : vector<8x32xf32>
    %24 = tpu.matmul %5, %23, %cst_26 {dimension_numbers = #tpu.dot_dimension_numbers<[1], [0], [0], [1], [0, 0, 1, 1], [], []>} : vector<8x32xf32>, vector<32x32xf32>, vector<8x32xf32> -> vector<8x32xf32>
    %c2_27 = arith.constant 2 : index
    %c0_28 = arith.constant 0 : index
    %c0_29 = arith.constant 0 : index
    %25 = vector.load %arg7[%c2_27, %c0_28, %c0_29] : memref<3x1x32xf32, #tpu.memory_space<vmem>>, vector<1x1x32xf32>
    %26 = vector.shape_cast %25 : vector<1x1x32xf32> to vector<1x32xf32>
    %27 = vector.broadcast %26 : vector<1x32xf32> to vector<8x32xf32>
    %28 = arith.addf %24, %27 : vector<8x32xf32>
    %29 = vector.extract_strided_slice %14 {offsets = [0, 0], sizes = [8, 8], strides = [1, 1]} : vector<8x32xf32> to vector<8x8xf32>
    %30 = vector.extract_strided_slice %21 {offsets = [0, 0], sizes = [8, 8], strides = [1, 1]} : vector<8x32xf32> to vector<8x8xf32>
    "tpu.trace_start"() <{level = 10 : i32, message = "qd,kd->qk"}> : () -> ()
    %cst_30 = arith.constant dense<0.000000e+00> : vector<8x8xf32>
    %31 = tpu.matmul %29, %30, %cst_30 {dimension_numbers = #tpu.dot_dimension_numbers<[1], [1], [0], [0], [0, 0, 1, 0], [], []>} : vector<8x8xf32>, vector<8x8xf32>, vector<8x8xf32> -> vector<8x8xf32>
    "tpu.trace_stop"() : () -> ()
    %32 = arith.addf %31, %7 : vector<8x8xf32>
    %cst_31 = arith.constant dense<0xFF800000> : vector<8xf32>
    %33 = vector.multi_reduction <maximumf>, %32, %cst_31 [1] : vector<8x8xf32> to vector<8xf32>
    %34 = vector.shape_cast %33 : vector<8xf32> to vector<8x1xf32>
    %35 = vector.broadcast %34 : vector<8x1xf32> to vector<8x8xf32>
    %36 = arith.subf %32, %35 : vector<8x8xf32>
    %37 = math.exp %36 : vector<8x8xf32>
    %cst_32 = arith.constant dense<0.000000e+00> : vector<8xf32>
    %38 = vector.multi_reduction <add>, %37, %cst_32 [1] : vector<8x8xf32> to vector<8xf32>
    %39 = vector.shape_cast %38 : vector<8xf32> to vector<8x1xf32>
    %40 = tpu.reciprocal %39 {approx = true} : vector<8x1xf32> -> vector<8x1xf32>
    %41 = arith.mulf %39, %40 : vector<8x1xf32>
    %cst_33 = arith.constant 2.000000e+00 : f32
    %42 = vector.broadcast %cst_33 : f32 to vector<8x1xf32>
    %43 = arith.subf %42, %41 : vector<8x1xf32>
    %44 = arith.mulf %40, %43 : vector<8x1xf32>
    %45 = vector.broadcast %44 : vector<8x1xf32> to vector<8x8xf32>
    %46 = arith.mulf %37, %45 : vector<8x8xf32>
    %c0_34 = arith.constant 0 : index
    %c0_35 = arith.constant 0 : index
    %c0_36 = arith.constant 0 : index
    %c0_37 = arith.constant 0 : index
    %47 = vector.load %arg11[%c0_34, %c0_35, %c0_36, %c0_37] : memref<1x4x8x8xf32, #tpu.memory_space<vmem>>, vector<1x1x8x8xf32>
    %48 = vector.shape_cast %47 : vector<1x1x8x8xf32> to vector<8x8xf32>
    %49 = vector.shape_cast %46 : vector<8x8xf32> to vector<1x1x8x8xf32>
    tpu.vector_store %arg11[%c0_34, %c0_35, %c0_36, %c0_37], %49 {strides = array<i32>} : memref<1x4x8x8xf32, #tpu.memory_space<vmem>>, vector<1x1x8x8xf32>,
    %50 = vector.extract_strided_slice %28 {offsets = [0, 0], sizes = [8, 8], strides = [1, 1]} : vector<8x32xf32> to vector<8x8xf32>
    %cst_38 = arith.constant dense<0.000000e+00> : vector<8x8xf32>
    %51 = tpu.matmul %46, %50, %cst_38 {dimension_numbers = #tpu.dot_dimension_numbers<[1], [0], [0], [1], [0, 0, 1, 1], [], []>} : vector<8x8xf32>, vector<8x8xf32>, vector<8x8xf32> -> vector<8x8xf32>
    %c0_39 = arith.constant 0 : index
    %c0_40 = arith.constant 0 : index
    %c0_41 = arith.constant 0 : index
    %52 = vector.load %arg8[%c0_39, %c0_40, %c0_41] : memref<4x8x32xf32, #tpu.memory_space<vmem>>, vector<1x8x32xf32>
    %53 = vector.shape_cast %52 : vector<1x8x32xf32> to vector<8x32xf32>
    %cst_42 = arith.constant dense<0.000000e+00> : vector<8x32xf32>
    %54 = tpu.matmul %51, %53, %cst_42 {dimension_numbers = #tpu.dot_dimension_numbers<[1], [0], [0], [1], [0, 0, 1, 1], [], []>} : vector<8x8xf32>, vector<8x32xf32>, vector<8x32xf32> -> vector<8x32xf32>
    %55 = vector.extract_strided_slice %14 {offsets = [0, 8], sizes = [8, 8], strides = [1, 1]} : vector<8x32xf32> to vector<8x8xf32>
    %56 = vector.extract_strided_slice %21 {offsets = [0, 8], sizes = [8, 8], strides = [1, 1]} : vector<8x32xf32> to vector<8x8xf32>
    "tpu.trace_start"() <{level = 10 : i32, message = "qd,kd->qk"}> : () -> ()
    %cst_43 = arith.constant dense<0.000000e+00> : vector<8x8xf32>
    %57 = tpu.matmul %55, %56, %cst_43 {dimension_numbers = #tpu.dot_dimension_numbers<[1], [1], [0], [0], [0, 0, 1, 0], [], []>} : vector<8x8xf32>, vector<8x8xf32>, vector<8x8xf32> -> vector<8x8xf32>
    "tpu.trace_stop"() : () -> ()
    %58 = arith.addf %57, %7 : vector<8x8xf32>
    %cst_44 = arith.constant dense<0xFF800000> : vector<8xf32>
    %59 = vector.multi_reduction <maximumf>, %58, %cst_44 [1] : vector<8x8xf32> to vector<8xf32>
    %60 = vector.shape_cast %59 : vector<8xf32> to vector<8x1xf32>
    %61 = vector.broadcast %60 : vector<8x1xf32> to vector<8x8xf32>
    %62 = arith.subf %58, %61 : vector<8x8xf32>
    %63 = math.exp %62 : vector<8x8xf32>
    %cst_45 = arith.constant dense<0.000000e+00> : vector<8xf32>
    %64 = vector.multi_reduction <add>, %63, %cst_45 [1] : vector<8x8xf32> to vector<8xf32>
    %65 = vector.shape_cast %64 : vector<8xf32> to vector<8x1xf32>
    %66 = tpu.reciprocal %65 {approx = true} : vector<8x1xf32> -> vector<8x1xf32>
    %67 = arith.mulf %65, %66 : vector<8x1xf32>
    %cst_46 = arith.constant 2.000000e+00 : f32
    %68 = vector.broadcast %cst_46 : f32 to vector<8x1xf32>
    %69 = arith.subf %68, %67 : vector<8x1xf32>
    %70 = arith.mulf %66, %69 : vector<8x1xf32>
    %71 = vector.broadcast %70 : vector<8x1xf32> to vector<8x8xf32>
    %72 = arith.mulf %63, %71 : vector<8x8xf32>
    %c0_47 = arith.constant 0 : index
    %c1_48 = arith.constant 1 : index
    %c0_49 = arith.constant 0 : index
    %c0_50 = arith.constant 0 : index
    %73 = vector.load %arg11[%c0_47, %c1_48, %c0_49, %c0_50] : memref<1x4x8x8xf32, #tpu.memory_space<vmem>>, vector<1x1x8x8xf32>
    %74 = vector.shape_cast %73 : vector<1x1x8x8xf32> to vector<8x8xf32>
    %75 = vector.shape_cast %72 : vector<8x8xf32> to vector<1x1x8x8xf32>
    tpu.vector_store %arg11[%c0_47, %c1_48, %c0_49, %c0_50], %75 {strides = array<i32>} : memref<1x4x8x8xf32, #tpu.memory_space<vmem>>, vector<1x1x8x8xf32>,
    %76 = vector.extract_strided_slice %28 {offsets = [0, 8], sizes = [8, 8], strides = [1, 1]} : vector<8x32xf32> to vector<8x8xf32>
    %cst_51 = arith.constant dense<0.000000e+00> : vector<8x8xf32>
    %77 = tpu.matmul %72, %76, %cst_51 {dimension_numbers = #tpu.dot_dimension_numbers<[1], [0], [0], [1], [0, 0, 1, 1], [], []>} : vector<8x8xf32>, vector<8x8xf32>, vector<8x8xf32> -> vector<8x8xf32>
    %c1_52 = arith.constant 1 : index
    %c0_53 = arith.constant 0 : index
    %c0_54 = arith.constant 0 : index
    %78 = vector.load %arg8[%c1_52, %c0_53, %c0_54] : memref<4x8x32xf32, #tpu.memory_space<vmem>>, vector<1x8x32xf32>
    %79 = vector.shape_cast %78 : vector<1x8x32xf32> to vector<8x32xf32>
    %cst_55 = arith.constant dense<0.000000e+00> : vector<8x32xf32>
    %80 = tpu.matmul %77, %79, %cst_55 {dimension_numbers = #tpu.dot_dimension_numbers<[1], [0], [0], [1], [0, 0, 1, 1], [], []>} : vector<8x8xf32>, vector<8x32xf32>, vector<8x32xf32> -> vector<8x32xf32>
    %81 = arith.addf %54, %80 : vector<8x32xf32>
    %82 = vector.extract_strided_slice %14 {offsets = [0, 16], sizes = [8, 8], strides = [1, 1]} : vector<8x32xf32> to vector<8x8xf32>
    %83 = vector.extract_strided_slice %21 {offsets = [0, 16], sizes = [8, 8], strides = [1, 1]} : vector<8x32xf32> to vector<8x8xf32>
    "tpu.trace_start"() <{level = 10 : i32, message = "qd,kd->qk"}> : () -> ()
    %cst_56 = arith.constant dense<0.000000e+00> : vector<8x8xf32>
    %84 = tpu.matmul %82, %83, %cst_56 {dimension_numbers = #tpu.dot_dimension_numbers<[1], [1], [0], [0], [0, 0, 1, 0], [], []>} : vector<8x8xf32>, vector<8x8xf32>, vector<8x8xf32> -> vector<8x8xf32>
    "tpu.trace_stop"() : () -> ()
    %85 = arith.addf %84, %7 : vector<8x8xf32>
    %cst_57 = arith.constant dense<0xFF800000> : vector<8xf32>
    %86 = vector.multi_reduction <maximumf>, %85, %cst_57 [1] : vector<8x8xf32> to vector<8xf32>
    %87 = vector.shape_cast %86 : vector<8xf32> to vector<8x1xf32>
    %88 = vector.broadcast %87 : vector<8x1xf32> to vector<8x8xf32>
    %89 = arith.subf %85, %88 : vector<8x8xf32>
    %90 = math.exp %89 : vector<8x8xf32>
    %cst_58 = arith.constant dense<0.000000e+00> : vector<8xf32>
    %91 = vector.multi_reduction <add>, %90, %cst_58 [1] : vector<8x8xf32> to vector<8xf32>
    %92 = vector.shape_cast %91 : vector<8xf32> to vector<8x1xf32>
    %93 = tpu.reciprocal %92 {approx = true} : vector<8x1xf32> -> vector<8x1xf32>
    %94 = arith.mulf %92, %93 : vector<8x1xf32>
    %cst_59 = arith.constant 2.000000e+00 : f32
    %95 = vector.broadcast %cst_59 : f32 to vector<8x1xf32>
    %96 = arith.subf %95, %94 : vector<8x1xf32>
    %97 = arith.mulf %93, %96 : vector<8x1xf32>
    %98 = vector.broadcast %97 : vector<8x1xf32> to vector<8x8xf32>
    %99 = arith.mulf %90, %98 : vector<8x8xf32>
    %c0_60 = arith.constant 0 : index
    %c2_61 = arith.constant 2 : index
    %c0_62 = arith.constant 0 : index
    %c0_63 = arith.constant 0 : index
    %100 = vector.load %arg11[%c0_60, %c2_61, %c0_62, %c0_63] : memref<1x4x8x8xf32, #tpu.memory_space<vmem>>, vector<1x1x8x8xf32>
    %101 = vector.shape_cast %100 : vector<1x1x8x8xf32> to vector<8x8xf32>
    %102 = vector.shape_cast %99 : vector<8x8xf32> to vector<1x1x8x8xf32>
    tpu.vector_store %arg11[%c0_60, %c2_61, %c0_62, %c0_63], %102 {strides = array<i32>} : memref<1x4x8x8xf32, #tpu.memory_space<vmem>>, vector<1x1x8x8xf32>,
    %103 = vector.extract_strided_slice %28 {offsets = [0, 16], sizes = [8, 8], strides = [1, 1]} : vector<8x32xf32> to vector<8x8xf32>
    %cst_64 = arith.constant dense<0.000000e+00> : vector<8x8xf32>
    %104 = tpu.matmul %99, %103, %cst_64 {dimension_numbers = #tpu.dot_dimension_numbers<[1], [0], [0], [1], [0, 0, 1, 1], [], []>} : vector<8x8xf32>, vector<8x8xf32>, vector<8x8xf32> -> vector<8x8xf32>
    %c2_65 = arith.constant 2 : index
    %c0_66 = arith.constant 0 : index
    %c0_67 = arith.constant 0 : index
    %105 = vector.load %arg8[%c2_65, %c0_66, %c0_67] : memref<4x8x32xf32, #tpu.memory_space<vmem>>, vector<1x8x32xf32>
    %106 = vector.shape_cast %105 : vector<1x8x32xf32> to vector<8x32xf32>
    %cst_68 = arith.constant dense<0.000000e+00> : vector<8x32xf32>
    %107 = tpu.matmul %104, %106, %cst_68 {dimension_numbers = #tpu.dot_dimension_numbers<[1], [0], [0], [1], [0, 0, 1, 1], [], []>} : vector<8x8xf32>, vector<8x32xf32>, vector<8x32xf32> -> vector<8x32xf32>
    %108 = arith.addf %81, %107 : vector<8x32xf32>
    %109 = vector.extract_strided_slice %14 {offsets = [0, 24], sizes = [8, 8], strides = [1, 1]} : vector<8x32xf32> to vector<8x8xf32>
    %110 = vector.extract_strided_slice %21 {offsets = [0, 24], sizes = [8, 8], strides = [1, 1]} : vector<8x32xf32> to vector<8x8xf32>
    "tpu.trace_start"() <{level = 10 : i32, message = "qd,kd->qk"}> : () -> ()
    %cst_69 = arith.constant dense<0.000000e+00> : vector<8x8xf32>
    %111 = tpu.matmul %109, %110, %cst_69 {dimension_numbers = #tpu.dot_dimension_numbers<[1], [1], [0], [0], [0, 0, 1, 0], [], []>} : vector<8x8xf32>, vector<8x8xf32>, vector<8x8xf32> -> vector<8x8xf32>
    "tpu.trace_stop"() : () -> ()
    %112 = arith.addf %111, %7 : vector<8x8xf32>
    %cst_70 = arith.constant dense<0xFF800000> : vector<8xf32>
    %113 = vector.multi_reduction <maximumf>, %112, %cst_70 [1] : vector<8x8xf32> to vector<8xf32>
    %114 = vector.shape_cast %113 : vector<8xf32> to vector<8x1xf32>
    %115 = vector.broadcast %114 : vector<8x1xf32> to vector<8x8xf32>
    %116 = arith.subf %112, %115 : vector<8x8xf32>
    %117 = math.exp %116 : vector<8x8xf32>
    %cst_71 = arith.constant dense<0.000000e+00> : vector<8xf32>
    %118 = vector.multi_reduction <add>, %117, %cst_71 [1] : vector<8x8xf32> to vector<8xf32>
    %119 = vector.shape_cast %118 : vector<8xf32> to vector<8x1xf32>
    %120 = tpu.reciprocal %119 {approx = true} : vector<8x1xf32> -> vector<8x1xf32>
    %121 = arith.mulf %119, %120 : vector<8x1xf32>
    %cst_72 = arith.constant 2.000000e+00 : f32
    %122 = vector.broadcast %cst_72 : f32 to vector<8x1xf32>
    %123 = arith.subf %122, %121 : vector<8x1xf32>
    %124 = arith.mulf %120, %123 : vector<8x1xf32>
    %125 = vector.broadcast %124 : vector<8x1xf32> to vector<8x8xf32>
    %126 = arith.mulf %117, %125 : vector<8x8xf32>
    %c0_73 = arith.constant 0 : index
    %c3 = arith.constant 3 : index
    %c0_74 = arith.constant 0 : index
    %c0_75 = arith.constant 0 : index
    %127 = vector.load %arg11[%c0_73, %c3, %c0_74, %c0_75] : memref<1x4x8x8xf32, #tpu.memory_space<vmem>>, vector<1x1x8x8xf32>
    %128 = vector.shape_cast %127 : vector<1x1x8x8xf32> to vector<8x8xf32>
    %129 = vector.shape_cast %126 : vector<8x8xf32> to vector<1x1x8x8xf32>
    tpu.vector_store %arg11[%c0_73, %c3, %c0_74, %c0_75], %129 {strides = array<i32>} : memref<1x4x8x8xf32, #tpu.memory_space<vmem>>, vector<1x1x8x8xf32>,
    %130 = vector.extract_strided_slice %28 {offsets = [0, 24], sizes = [8, 8], strides = [1, 1]} : vector<8x32xf32> to vector<8x8xf32>
    %cst_76 = arith.constant dense<0.000000e+00> : vector<8x8xf32>
    %131 = tpu.matmul %126, %130, %cst_76 {dimension_numbers = #tpu.dot_dimension_numbers<[1], [0], [0], [1], [0, 0, 1, 1], [], []>} : vector<8x8xf32>, vector<8x8xf32>, vector<8x8xf32> -> vector<8x8xf32>
    %c3_77 = arith.constant 3 : index
    %c0_78 = arith.constant 0 : index
    %c0_79 = arith.constant 0 : index
    %132 = vector.load %arg8[%c3_77, %c0_78, %c0_79] : memref<4x8x32xf32, #tpu.memory_space<vmem>>, vector<1x8x32xf32>
    %133 = vector.shape_cast %132 : vector<1x8x32xf32> to vector<8x32xf32>
    %cst_80 = arith.constant dense<0.000000e+00> : vector<8x32xf32>
    %134 = tpu.matmul %131, %133, %cst_80 {dimension_numbers = #tpu.dot_dimension_numbers<[1], [0], [0], [1], [0, 0, 1, 1], [], []>} : vector<8x8xf32>, vector<8x32xf32>, vector<8x32xf32> -> vector<8x32xf32>
    %135 = arith.addf %108, %134 : vector<8x32xf32>
    %c0_81 = arith.constant 0 : index
    %c0_82 = arith.constant 0 : index
    %136 = vector.load %arg9[%c0_81, %c0_82] : memref<1x32xf32, #tpu.memory_space<vmem>>, vector<1x32xf32>
    %137 = vector.broadcast %136 : vector<1x32xf32> to vector<8x32xf32>
    %138 = arith.addf %135, %137 : vector<8x32xf32>
    %c0_83 = arith.constant 0 : index
    %c0_84 = arith.constant 0 : index
    %c0_85 = arith.constant 0 : index
    %139 = vector.load %arg10[%c0_83, %c0_84, %c0_85] : memref<1x8x32xf32, #tpu.memory_space<vmem>>, vector<1x8x32xf32>
    %140 = vector.shape_cast %139 : vector<1x8x32xf32> to vector<8x32xf32>
    %141 = vector.shape_cast %138 : vector<8x32xf32> to vector<1x8x32xf32>
    tpu.vector_store %arg10[%c0_83, %c0_84, %c0_85], %141 {strides = array<i32>} : memref<1x8x32xf32, #tpu.memory_space<vmem>>, vector<1x8x32xf32>,
    return
  }
  func.func @transform_0(%arg0: i32, %arg1: i32) -> (i32, i32, i32) {
    %c0_i32 = arith.constant 0 : i32
    %c0_i32_0 = arith.constant 0 : i32
    return %arg0, %arg1, %c0_i32 : i32, i32, i32
  }
  func.func @transform_1(%arg0: i32, %arg1: i32) -> (i32, i32, i32) {
    %c0_i32 = arith.constant 0 : i32
    %c0_i32_0 = arith.constant 0 : i32
    %c0_i32_1 = arith.constant 0 : i32
    return %arg0, %c0_i32, %c0_i32_0 : i32, i32, i32
  }
  func.func @transform_2(%arg0: i32, %arg1: i32) -> (i32, i32, i32) {
    %c0_i32 = arith.constant 0 : i32
    %c0_i32_0 = arith.constant 0 : i32
    %c0_i32_1 = arith.constant 0 : i32
    return %arg0, %c0_i32, %c0_i32_0 : i32, i32, i32
  }
  func.func @transform_3(%arg0: i32, %arg1: i32) -> (i32, i32, i32, i32) {
    %c0_i32 = arith.constant 0 : i32
    %c0_i32_0 = arith.constant 0 : i32
    %c0_i32_1 = arith.constant 0 : i32
    return %arg0, %c0_i32, %arg1, %c0_i32_0 : i32, i32, i32, i32
  }
  func.func @transform_4(%arg0: i32, %arg1: i32) -> (i32, i32, i32) {
    %c0_i32 = arith.constant 0 : i32
    %c0_i32_0 = arith.constant 0 : i32
    %c0_i32_1 = arith.constant 0 : i32
    %c0_i32_2 = arith.constant 0 : i32
    return %c0_i32, %c0_i32_0, %c0_i32_1 : i32, i32, i32
  }
  func.func @transform_5(%arg0: i32, %arg1: i32) -> (i32, i32, i32) {
    %c0_i32 = arith.constant 0 : i32
    %c0_i32_0 = arith.constant 0 : i32
    %c0_i32_1 = arith.constant 0 : i32
    %c0_i32_2 = arith.constant 0 : i32
    return %c0_i32, %c0_i32_0, %c0_i32_1 : i32, i32, i32
  }
  func.func @transform_6(%arg0: i32, %arg1: i32) -> (i32, i32, i32) {
    %c0_i32 = arith.constant 0 : i32
    %c0_i32_0 = arith.constant 0 : i32
    %c0_i32_1 = arith.constant 0 : i32
    %c0_i32_2 = arith.constant 0 : i32
    return %c0_i32, %c0_i32_0, %c0_i32_1 : i32, i32, i32
  }
  func.func @transform_7(%arg0: i32, %arg1: i32) -> (i32, i32) {
    %c0_i32 = arith.constant 0 : i32
    %c0_i32_0 = arith.constant 0 : i32
    %c0_i32_1 = arith.constant 0 : i32
    return %c0_i32, %c0_i32_0 : i32, i32
  }
  func.func @transform_8(%arg0: i32, %arg1: i32) -> (i32, i32, i32) {
    %c0_i32 = arith.constant 0 : i32
    %c0_i32_0 = arith.constant 0 : i32
    return %arg0, %arg1, %c0_i32 : i32, i32, i32
  }
  func.func @transform_9(%arg0: i32, %arg1: i32) -> (i32, i32, i32, i32) {
    %c0_i32 = arith.constant 0 : i32
    %c0_i32_0 = arith.constant 0 : i32
    %c0_i32_1 = arith.constant 0 : i32
    return %arg0, %c0_i32, %arg1, %c0_i32_0 : i32, i32, i32, i32
  }
}

</mosaic_0001>

<bundles_post_ra>
// kernel: tpu_custom_call.1
= control target key start
LH: loop header
LB: loop body
LE: loop exit
PB: predicated region body
PF: predicated region fallthrough
CT: control target
= control target key end

     0   :  { %s3104_s0 = inlined_call_operand.hbm [shape: f32[2,8,32], index: 0, kind: input, shape index: {}]   ;;  %s3105_s1 = inlined_call_operand.hbm [shape: f32[2,8,32], index: 1, kind: input, shape index: {}]   ;;  %s3106_s2 = inlined_call_operand.hbm [shape: f32[2,8,32], index: 2, kind: input, shape index: {}]   ;;  %s3107_s3 = inlined_call_operand.hbm [shape: f32[2,1,8,8], index: 3, kind: input, shape index: {}]   ;;  %s3108_s4 = inlined_call_operand.hbm [shape: f32[3,32,32], index: 4, kind: input, shape index: {}]   ;;  %s3109_s5 = inlined_call_operand.vmem [shape: f32[3,1,32], index: 5, kind: input, shape index: {}]   ;;  %s3110_s6 = inlined_call_operand.hbm [shape: f32[4,8,32], index: 6, kind: input, shape index: {}]   ;;  %s3111_s7 = inlined_call_operand.vmem [shape: f32[1,32], index: 7, kind: input, shape index: {}]   ;;  %s3112_s8 = inlined_call_operand.hbm [shape: f32[2,8,32], index: 8, kind: output, shape index: {0}]   ;;  %s3113_s9 = inlined_call_operand.hbm [shape: f32[2,4,8,8], index: 9, kind: output, shape index: {1}]  }
   0x1   :  { %3130 = sst [smem:[#allocation28_spill]] %s3105_s1 }
   0x2   :  { %3131 = sst [smem:[#allocation29_spill]] %s3108_s4 }
   0x3   :  { %3132 = sst [smem:[#allocation30_spill]] %s3111_s7 }
   0x4   :  { %3133 = sst [smem:[#allocation31_spill]] %s3112_s8 }
   0x5   :  { %3134 = sst [smem:[#allocation32_spill]] %s3113_s9 }
   0x6   :  { %15 = vsyncpa [#allocation3], 0 }
   0x7   :  { %17 = vsyncpa [#allocation3 + $0x1], 0 }
   0x8   :  { %18 = vsyncpa [#allocation6], 0 }
   0x9   :  { %20 = vsyncpa [#allocation6 + $0x1], 0 }
   0xa   :  { %21 = vsyncpa [#allocation9], 0 }
   0xb   :  { %23 = vsyncpa [#allocation9 + $0x1], 0 }
   0xc   :  { %24 = vsyncpa [#allocation12], 0 }
   0xd   :  { %25 = vsyncpa [#allocation4], 0 }
   0xe   :  { %27 = vsyncpa [#allocation4 + $0x1], 0 }
   0xf   :  { %28 = vsyncpa [#allocation15], 0 }
  0x10   :  { %30 = vsyncpa [#allocation15 + $0x1], 0  ;;  %s2680_s30 = smov 0   ;;  %s2682_s10 = smov 0  }
  0x11   :  { %s2684_s11 = smov 0   ;;  %s2686_s12 = smov 0  }
  0x12   :  { %s2688_s13 = smov 0   ;;  %s2690_s14 = smov 0  }
  0x13 LB: > { %3135 = sst [smem:[#allocation23_spill]] %s2591_s30  ;;  %s2711_s15 = sadd.s32 4294967295, %s2611_s14   ;;  %s2611_s14 = sphi %s2690_s14, %s36_s14   ;;  %s2607_s13 = sphi %s2688_s13, %s3173_s13   ;;  %s2603_s12 = sphi %s2686_s12, %s3172_s12   ;;  %s2599_s11 = sphi %s2684_s11, %s3176_s11   ;;  %s2595_s10 = sphi %s2682_s10, %s3175_s10   ;;  %s2591_s30 = sphi %s2680_s30, %s3174_s30  }
  0x14   : > { %3136 = sst [smem:[#allocation24_spill]] %s2607_s13  ;;  %s2003_s16 = sadd.s32 4294967294, %s2611_s14  }
  0x15   : > { %p70_p0 = scmp.ne.s32.totalorder %s2595_s10, %s2591_s30  ;;  %p3122_p1 = scmp.eq.s32.totalorder %s2711_s15, 0 }
  0x16   : > { %p266_p3 = scmp.eq.s32.totalorder %s2003_s16, 1  ;;  %p2004_p5 = scmp.ge.s32.totalorder %s2611_s14, 1 }
  0x17   : > { %p2720_p4 = por %p3122_p1, %p70_p0  ;;  %p301_p7 = scmp.lt.s32.totalorder %s2611_s14, 3 }
  0x18   : > { %p2725_p6 = por %p266_p3, %p70_p0  ;;  %s2613_s20 = smov [#allocation10]  }
  0x19   : > { %s3137_s17 = scalar_select %p2720_p4, 1, 0 }
  0x1a   : > { %s3138_s18 = scalar_select %p2725_p6, 1, 0 }
  0x1b   : > { %p2730_p8 = pnand %p2004_p5, %p301_p7  ;;  %s313_s21 = sshll.u32 %s2613_s20, 4  ;;  %s314_s21 = int_to_ptr.vmem [resolvable:$true] %s313_s21 }
  0x1c   : > { %3139 = sst [smem:[#allocation25_spill]] %s3138_s18  ;;  %s48_s23 = sadd.s32 1, %s2607_s13 }
  0x1d   : > { %s3140_s19 = scalar_select %p2730_p8, 1, 0 }
  0x1e   : > { %p2213_p9 = pneg %p2730_p8  ;;  %s2332_s24 = scalar_lea.vmem %s314_s21, 1536 }
  0x1f   : > { %p2333_p13 = scmp.ne.s32.totalorder %s314_s21, %s2332_s24  ;;  %p2340_p5 = scmp.lt.s32.totalorder %s314_s21, %s314_s21 }
  0x20   : > { %p2739_p11 = pnand %p2213_p9, %p3122_p1  ;;  %p2341_p7 = scmp.lt.s32.totalorder %s2332_s24, %s2332_s24 }
  0x22   : > { %p3123_p12 = pneg %p2739_p11  ;;  %p2342_p2 = por %p2341_p7, %p2340_p5 }
  0x24   : > { %p2335_p0 = pnand %p2333_p13, %p3123_p12 }
  0x26   : > { %p2336_p3 = pneg %p2335_p0 }
  0x28   : > { %p2343_p10 = pnand %p2342_p2, %p2336_p3 }
  0x2a   : > { %2346 = shalt.err (!%p2343_p10)
}
  0x2b   : > { %s3114_s25 = smov 128   ;;  %s3115_s26 = smov 8  }
  0x2c   : > { %s3142_s4 = sld [smem:[#allocation29_spill]]  ;;  %p50_p2 = scmp.ge.s32.totalorder %s48_s23, 2 }
  0x2d   : > { %s57_s29 = sadd.s32 1, %s2599_s11  ;;  %p64_p9 = scmp.ne.s32.totalorder %s2599_s11, %s2595_s10 }
  0x2e   : > { %p65_p10 = scmp.eq.s32.totalorder %s2611_s14, 0  ;;  %s3178_s23 = smov (%p50_p2, %s48_s23), 0 }
  0x2f   : > { %3143 = sst [smem:[#allocation26_spill]] %s3178_s23  ;;  %p3144_p0 = scmp.eq.s32.totalorder %s2711_s15, 1 }
  0x30   : > { %p66_p13 = por %p65_p10, %p64_p9  ;;  %s52_s20 = ssub.s32 %s2607_s13, %s3178_s23 }
  0x31   : > { %p2765_p3 = por %p3144_p0, %p64_p9  ;;  %p2242_p5 = scmp.lt.s32.totalorder %s2611_s14, 2 }
  0x32   : > { %2216 = dma.hbm_to_vmem [thread:$0]  (!%p2739_p11), %s3142_s4, 1536, %s314_s21, [#allocation9], %s3114_s25, %s3114_s25, %s3115_s26  }
  0x33   : > { %s3145_s16 = scalar_select %p2765_p3, 1, 0 }
  0x34   : > { %p55_p7 = scmp.eq.s32.totalorder %s52_s20, 0  ;;  %s3118_s24 = sand.u32 1, %s2599_s11  }
  0x35   : > { %s2775_s21 = sshll.u32 %s3118_s24, 3  ;;  %s2778_s27 = sshll.u32 %s2607_s13, 7 }
  0x36   : > { %s2781_s28 = scalar_select %p55_p7, %s2599_s11, %s57_s29  }
  0x37   : > { %p2783_p2 = pnand %p2242_p5, %p66_p13  ;;  %s3128_s26 = sand.u32 1, %s2611_s14  }
  0x38   : > { %3146 = sst [smem:[#allocation27_spill]] %s2781_s28  ;;  %s369_s18 = scalar_lea.vmem [#allocation5], %s2775_s21 }
  0x39   : > { %s3148_s1 = sld [smem:[#allocation28_spill]]  ;;  %s376_s24 = sshll.u32 %s369_s18, 4  ;;  %s377_s24 = int_to_ptr.vmem [resolvable:$true] %s376_s24 }
  0x3a   : > { %s2795_s13 = scalar_lea.sflag [#allocation6], %s3128_s26  ;;  %p3124_p9 = pneg %p2783_p2 }
  0x3b   : > { %s2360_s29 = scalar_lea.vmem %s377_s24, 128  ;;  %s2616_s28 = smov [#allocation5]  }
  0x3c   : > { %p2361_p10 = scmp.ne.s32.totalorder %s377_s24, %s2360_s29  ;;  %s2365_s30 = sshll.u32 %s2616_s28, 4  ;;  %s2366_s30 = int_to_ptr.vmem [resolvable:$false] %s2365_s30 }
  0x3d   : > { %s2367_s8 = scalar_lea.vmem %s2366_s30, 256  ;;  %p2368_p5 = scmp.lt.s32.totalorder %s377_s24, %s2366_s30 }
  0x3e   : > { %p2363_p13 = pnand %p2361_p10, %p3124_p9  ;;  %p2369_p7 = scmp.lt.s32.totalorder %s2367_s8, %s2360_s29 }
  0x3f   : > { %s374_s20 = scalar_lea.hbm %s3148_s1, %s2778_s27 }
  0x40   : > { %p2364_p0 = pneg %p2363_p13  ;;  %p2370_p1 = por %p2369_p7, %p2368_p5 }
  0x42   : > { %p2371_p12 = pnand %p2370_p1, %p2364_p0 }
  0x44   : > { %2374 = shalt.err (!%p2371_p12)
}
  0x45   : > { %2226 = dma.hbm_to_vmem [thread:$0]  (!%p2783_p2), %s374_s20, 128, %s377_s24, %s2795_s13  }
  0x46   : > { %s2617_s4 = smov [#allocation11]   ;;  %p3149_p13 = pneg %p2739_p11 }
  0x47   : > { %s329_s18 = sshll.u32 %s2617_s4, 4  ;;  %s330_s18 = int_to_ptr.vmem [resolvable:$true] %s329_s18 }
  0x48   : > { %s2386_s23 = scalar_lea.vmem %s330_s18, 512  ;;  %p2394_p3 = scmp.lt.s32.totalorder %s330_s18, %s330_s18 }
  0x49   : > { %p2387_p10 = scmp.ne.s32.totalorder %s330_s18, %s2386_s23  ;;  %p2395_p4 = scmp.lt.s32.totalorder %s2386_s23, %s2386_s23 }
  0x4b   : > { %p2389_p9 = pnand %p2387_p10, %p3149_p13  ;;  %p2396_p8 = por %p2395_p4, %p2394_p3 }
  0x4d   : > { %p2390_p6 = pneg %p2389_p9 }
  0x4f   : > { %p2397_p5 = pnand %p2396_p8, %p2390_p6 }
  0x51   : > { %2400 = shalt.err (!%p2397_p5)
}
  0x52   : > { %s3150_s8 = smov 8   ;;  %s3151_s30 = smov 128  }
  0x53   : > { %2219 = dma.hbm_to_vmem [thread:$0]  (!%p2739_p11), %s3110_s6, 512, %s330_s18, [#allocation12], %s3151_s30, %s3151_s30, %s3150_s8  }
  0x54   : > { %s356_s4 = scalar_lea.hbm %s3104_s0, %s2778_s27  ;;  %s350_s23 = scalar_lea.vmem [#allocation2], %s2775_s21 }
  0x55   : > { %s358_s26 = sshll.u32 %s350_s23, 4  ;;  %s3152_s1 = sand.u32 1, %s2599_s11   ;;  %s359_s26 = int_to_ptr.vmem [resolvable:$true] %s358_s26 }
  0x56   : > { %s347_s22 = scalar_lea.sflag [#allocation3], %s3152_s1  ;;  %s2414_s7 = scalar_lea.vmem %s359_s26, 128 }
  0x57   : > { %p2415_p1 = scmp.ne.s32.totalorder %s359_s26, %s2414_s7  ;;  %p3153_p4 = pneg %p2783_p2 }
  0x58   : > { %s2618_s24 = smov [#allocation2]  }
  0x59   : > { %p2417_p6 = pnand %p2415_p1, %p3153_p4  ;;  %s2419_s28 = sshll.u32 %s2618_s24, 4  ;;  %s2420_s28 = int_to_ptr.vmem [resolvable:$false] %s2419_s28 }
  0x5a   : > { %s2421_s9 = scalar_lea.vmem %s2420_s28, 256  ;;  %p2422_p11 = scmp.lt.s32.totalorder %s359_s26, %s2420_s28 }
  0x5b   : > { %p2418_p8 = pneg %p2417_p6  ;;  %p2423_p12 = scmp.lt.s32.totalorder %s2421_s9, %s2414_s7 }
  0x5d   : > { %p2424_p3 = por %p2423_p12, %p2422_p11 }
  0x5f   : > { %p2425_p9 = pnand %p2424_p3, %p2418_p8 }
  0x61   : > { %2428 = shalt.err (!%p2425_p9)
}
  0x62   : > { %2223 = dma.hbm_to_vmem [thread:$0]  (!%p2783_p2), %s356_s4, 128, %s359_s26, %s347_s22  }
  0x63   : > { %s392_s8 = scalar_lea.hbm %s3106_s2, %s2778_s27  ;;  %s387_s30 = scalar_lea.vmem [#allocation7], %s2775_s21 }
  0x64   : > { %s394_s20 = sshll.u32 %s387_s30, 4  ;;  %p3154_p7 = pmov %p3153_p4  ;;  %s395_s20 = int_to_ptr.vmem [resolvable:$true] %s394_s20 }
  0x65   : > { %s2442_s29 = scalar_lea.vmem %s395_s20, 128  ;;  %s2619_s7 = smov [#allocation7]  }
  0x66   : > { %p2443_p0 = scmp.ne.s32.totalorder %s395_s20, %s2442_s29  ;;  %s2447_s9 = sshll.u32 %s2619_s7, 4  ;;  %s2448_s9 = int_to_ptr.vmem [resolvable:$false] %s2447_s9 }
  0x67   : > { %s2449_s23 = scalar_lea.vmem %s2448_s9, 256  ;;  %p2450_p5 = scmp.lt.s32.totalorder %s395_s20, %s2448_s9 }
  0x68   : > { %p2445_p10 = pnand %p2443_p0, %p3154_p7  ;;  %p2451_p1 = scmp.lt.s32.totalorder %s2449_s23, %s2442_s29 }
  0x6a   : > { %p2446_p13 = pneg %p2445_p10  ;;  %p2452_p4 = por %p2451_p1, %p2450_p5 }
  0x6c   : > { %p2453_p6 = pnand %p2452_p4, %p2446_p13 }
  0x6e   : > { %2456 = shalt.err (!%p2453_p6)
}
  0x6f   : > { %2229 = dma.hbm_to_vmem [thread:$0]  (!%p2783_p2), %s392_s8, 128, %s395_s20, %s2795_s13  }
  0x70   : > { %s411_s22 = scalar_lea.hbm %s3107_s3, %s2778_s27  ;;  %s405_s24 = scalar_lea.vmem [#allocation8], %s2775_s21 }
  0x71   : > { %s413_s28 = sshll.u32 %s405_s24, 4  ;;  %s3155_s1 = sand.u32 1, %s2611_s14   ;;  %s414_s28 = int_to_ptr.vmem [resolvable:$true] %s413_s28 }
  0x72   : > { %s402_s18 = scalar_lea.sflag [#allocation9], %s3155_s1  ;;  %s2470_s30 = scalar_lea.vmem %s414_s28, 128 }
  0x73   : > { %p2471_p8 = scmp.ne.s32.totalorder %s414_s28, %s2470_s30  ;;  %p3156_p11 = pmov %p3154_p7 }
  0x74   : > { %s2620_s29 = smov [#allocation8]  }
  0x75   : > { %p2473_p12 = pnand %p2471_p8, %p3156_p11  ;;  %s2475_s7 = sshll.u32 %s2620_s29, 4  ;;  %s2476_s7 = int_to_ptr.vmem [resolvable:$false] %s2475_s7 }
  0x76   : > { %s2477_s9 = scalar_lea.vmem %s2476_s7, 256  ;;  %p2478_p9 = scmp.lt.s32.totalorder %s414_s28, %s2476_s7 }
  0x77   : > { %p2474_p3 = pneg %p2473_p12  ;;  %p2479_p0 = scmp.lt.s32.totalorder %s2477_s9, %s2470_s30 }
  0x79   : > { %p2480_p7 = por %p2479_p0, %p2478_p9 }
  0x7b   : > { %p2481_p10 = pnand %p2480_p7, %p2474_p3 }
  0x7d   : > { %2484 = shalt.err (!%p2481_p10)
}
  0x7e   : > { %2232 = dma.hbm_to_vmem [thread:$0]  (!%p2783_p2), %s411_s22, 128, %s414_s28, %s402_s18  }
  0x7f   : > { %p3157_p13 = scmp.ne.s32.totalorder %s3140_s19, 0 }
  0x80   : > { %s2854_s13 = sand.u32 (!%p3157_p13), 1, %s2595_s10   ;;  %p3158_p5 = scmp.ne.s32.totalorder (!%p3157_p13), %s3137_s17, 0 }
  0x81   : > { %422 = sbr.rel (%p3157_p13) target bundleno = 2615 (0xa37), region = 52  ;;  %s2857_s21 = sshll.u32 (!%p3157_p13), %s2854_s13, 3 }
  0x82   : > { %s425_s27 = scalar_lea.sflag (!%p3157_p13), [#allocation3], %s2854_s13  ;;  %s428_s8 = scalar_lea.vmem (!%p3157_p13), [#allocation2], %s2857_s21 }
  0x86   : > { %2562 = dma.done.wait (%p3158_p5), %s425_s27, 128  }
  0x87   : > { %2564 = vsyncadd (%p3158_p5), %s425_s27, 4294967168  ;;  %s433_s19 = sand.u32 1, %s2711_s15   ;;  %s437_s20 = scalar_lea.vmem [#allocation5], %s2857_s21 }
  0x88   : > { %s434_s25 = scalar_lea.sflag [#allocation6], %s433_s19 }
  0x89   : > { %2566 = dma.done.wait (%p3158_p5), %s434_s25, 256  }
  0x8a   : > { %2568 = vsyncadd (%p3158_p5), %s434_s25, 4294967040  ;;  %s446_s23 = scalar_lea.vmem [#allocation7], %s2857_s21  ;;  %s452_s26 = scalar_lea.sflag [#allocation9], %s433_s19 }
  0x8b   : > { %s455_s4 = scalar_lea.vmem [#allocation8], %s2857_s21 }
  0x8c   : > { %2570 = dma.done.wait (%p3158_p5), %s452_s26, 128  }
  0x8d   : > { %2572 = vsyncadd (%p3158_p5), %s452_s26, 4294967168  ;;  %p3159_p2 = scmp.eq.s32.totalorder %s2711_s15, 0 }
  0x8f   : > { %2574 = dma.done.wait (%p3159_p2), [#allocation9], 1536   ;;  %p3160_p1 = pmov %p3159_p2 }
  0x91   : > { %2576 = vsyncadd (%p3160_p1), [#allocation9], 4294965760  ;;  %p3161_p4 = pmov %p3160_p1 }
  0x92   : > { %p3162_p6 = pmov %p3160_p1 }
  0x93   : > { %2578 = dma.done.wait (%p3161_p4), [#allocation12], 512  }
  0x94   : > { %2580 = vsyncadd (%p3162_p6), [#allocation12], 4294966784  ;;  %v2621_v0 = vmov 0.0   ;;  %vm2622_vm0 = vmmov 0   ;;  %v611_v1 = vld [vmem:[#allocation10 + $0x38] sm:$0xff]  ;;  %v610_v3 = vld [vmem:[#allocation10 + $0x30] sm:$0xff] }
  0x95   : > { %2111 = vmatprep.subr.mxu1 %v2621_v0  ;;  %2100 = vmatprep.subr.mxu0 %v2621_v0  ;;  %v525_v2 = vld [vmem:[#allocation10 + $0x18] sm:$0xff]  ;;  %v524_v4 = vld [vmem:[#allocation10 + $0x10] sm:$0xff]  ;;  %v609_v5 = vld [vmem:[#allocation10 + $0x28] sm:$0xff]  ;;  %vm533_vm1 = vcmask 261120   ;;  %vm779_vm2 = vcmask 64512   ;;  %s2623_s28 = smov 120  }
  0x96   : > { %2119 = vmatprep.mubr.msk.f32.mxu1 %vm2622_vm0, %v2621_v0  ;;  %2108 = vmatprep.mubr.msk.f32.mxu0 %vm2622_vm0, %v2621_v0  ;;  %v523_v6 = vld [vmem:[#allocation10 + $0x8] sm:$0xff]  ;;  %v608_v7 = vld [vmem:[#allocation10 + $0x20] sm:$0xff]  ;;  %v519_v9 = vld [vmem:[%s437_s20] sm:$0xff]  ;;  %s2624_s30 = smov 112   ;;  %s2024_s29 = sshll.u32 %s2854_s13, 5 }
  0x97   : > { %2112 = vmatpush3.msra.mxu1 %v611_v1  ;;  %2101 = vmatpush3.msra.mxu0 %v525_v2  ;;  %v522_v8 = vld [vmem:[#allocation10] sm:$0xff]  ;;  %v697_v11 = vld [vmem:[#allocation10 + $0x58] sm:$0xff]  ;;  %v696_v12 = vld [vmem:[#allocation10 + $0x50] sm:$0xff]  ;;  %s2968_s7 = scalar_lea.vmem [#allocation14], %s2024_s29  ;;  %s2625_s9 = smov 104  }
  0x98   : > { %2113 = vmatprep.subr.mxu1 %v2621_v0  ;;  %2102 = vmatprep.subr.mxu0 %v2621_v0  ;;  %v518_v10 = vld [vmem:[%s428_s8] sm:$0xff]  ;;  %v2953_v30 = vld [vmem:[%s455_s4] sm:$0xff]  ;;  %s2060_s27 = sshll.u32 %s2603_s12, 9  ;;  %s1799_s8 = sshll.u32 %s2968_s7, 4  ;;  %s3034_s8 = int_to_ptr.vmem [resolvable:$true] %s1799_s8 }
  0x99   : > { %2114 = vmatpush3.msra.mxu1 %v610_v3  ;;  %2103 = vmatpush3.msra.mxu0 %v524_v4  ;;  %v695_v13 = vld [vmem:[#allocation10 + $0x48] sm:$0xff]  ;;  %v694_v14 = vld [vmem:[#allocation10 + $0x40] sm:$0xff]  ;;  %s3163_s20 = sld [smem:[#allocation32_spill]]  ;;  %s1771_s26 = scalar_lea.sflag [#allocation15], %s2854_s13 }
  0x9a   : > { %2115 = vmatprep.subr.mxu1 %v2621_v0  ;;  %2104 = vmatprep.subr.mxu0 %v2621_v0  ;;  %v520_v15 = vld [vmem:[%s446_s23] sm:$0xff]  ;;  %s2485_s4 = scalar_lea.vmem %s3034_s8, 512  ;;  %p3164_p11 = scmp.ne.s32.totalorder %s3145_s16, 0 }
  0x9b   : > { %2116 = vmatpush3.msra.mxu1 %v609_v5  ;;  %2105 = vmatpush3.msra.mxu0 %v523_v6  ;;  %v2028_v16 = vld [vmem:[%s3109_s5 + $0x1] ss:$0 sm:$0xff]  ;;  %v2025_v17 = vld [vmem:[%s3109_s5] ss:$0 sm:$0xff]  ;;  %v2031_v24 = vld [vmem:[%s3109_s5 + $0x2] ss:$0 sm:$0xff]  ;;  %p2486_p8 = scmp.ne.s32.totalorder %s3034_s8, %s2485_s4 }
  0x9c   : > { %2117 = vmatprep.subr.mxu1 %v2621_v0  ;;  %2106 = vmatprep.subr.mxu0 %v2621_v0  ;;  %v1117_v55 = vld [vmem:[#allocation11 + $0x8] sm:$0xff]  ;;  %v944_v63 = vld [vmem:[#allocation11] sm:$0xff]  ;;  %s2626_s15 = smov [#allocation14]  }
  0x9d   : > { %2118 = vmatpush3.msra.mxu1 %v608_v7  ;;  %2107 = vmatpush3.msra.mxu0 %v522_v8  ;;  %p2487_p12 = pnand %p2486_p8, %p3164_p11  ;;  %s2489_s17 = sshll.u32 %s2626_s15, 4  ;;  %s2490_s17 = int_to_ptr.vmem [resolvable:$false] %s2489_s17 }
  0x9e   : > { %2120 = vmatmul.mubr.msk.f32.vlgmr.msra.gmra.mxu1 %vm533_vm1, %v519_v9  ;;  %2109 = vmatmul.mubr.msk.f32.vlgmr.msra.gmra.mxu0 %vm533_vm1, %v518_v10  ;;  %s2491_s22 = scalar_lea.vmem %s2490_s17, 1024  ;;  %p2492_p9 = scmp.lt.s32.totalorder %s3034_s8, %s2490_s17 }
  0x9f   : > { %2133 = vmatprep.subr.mxu1 %v2621_v0  ;;  %2135 = vmatprep.mubr.msk.f32.mxu1 %vm2622_vm0, %v2621_v0  ;;  %s3032_s23 = scalar_lea.hbm %s3163_s20, %s2060_s27  ;;  %p2488_p3 = pneg %p2487_p12 }
  0xa0   : > { %2122 = vmatprep.subr.mxu0 %v2621_v0  ;;  %2130 = vmatprep.mubr.msk.f32.mxu0 %vm2622_vm0, %v2621_v0  ;;  %p2493_p0 = scmp.lt.s32.totalorder %s2491_s22, %s2485_s4 }
  0xa1   : > { %2123 = vmatpush3.msra.mxu0 %v697_v11 }
  0xa2   : > { %2124 = vmatprep.subr.mxu0 %v2621_v0  ;;  %p2494_p7 = por %p2493_p0, %p2492_p9 }
  0xa3   : > { %2125 = vmatpush3.msra.mxu0 %v696_v12 }
  0xa4   : > { %2126 = vmatprep.subr.mxu0 %v2621_v0  ;;  %p2495_p10 = pnand %p2494_p7, %p2488_p3 }
  0xa5   : > { %2127 = vmatpush3.msra.mxu0 %v695_v13 }
  0xa6   : > { %2128 = vmatprep.subr.mxu0 %v2621_v0 }
  0xa7   : > { %2129 = vmatpush3.msra.mxu0 %v694_v14 }
  0xa8   : > { %2131 = vmatmul.mubr.msk.f32.vlgmr.msra.gmra.mxu0 %vm533_vm1, %v520_v15  ;;  %2143 = vmatprep.subr.mxu0 %v2621_v0 }
  0xa9   : > { %2145 = vmatprep.mubr.msk.f32.mxu0 %vm2622_vm0, %v2621_v0 }
 0x15e   : > { %v689_v18 = vpop.f32.mrf.mxu1  ;;  %v603_v19 = vpop.f32.mrf.mxu0 }
 0x15f   : > { %v2924_v20 = vadd.f32 %v2028_v16, %v689_v18  ;;  %v2926_v21 = vadd.f32 %v2025_v17, %v603_v19 }
 0x160   : > { %v2121_v22 = vpop.f32.mrf.mxu1  ;;  %v2110_v23 = vpop.f32.mrf.mxu0 }
 0x161   : > { %947 = vrot.lane.b32.xlu0 %v2924_v20, %s2623_s28  ;;  %2134 = vmatpush3.xpose.msk.msra.mxu1 %vm779_vm2, %v2924_v20 }
 0x162   : > { %2138 = vmatprep.subr.mxu1 %v2621_v0 }
 0x164   : > { %2136 = vmatmul.mubr.msk.f32.vlgmr.msra.gmra.mxu1 %vm779_vm2, %v2926_v21 }
 0x165   : > { %945 = vrot.lane.b32.xlu0 %v2926_v21, %s2623_s28  ;;  %2140 = vmatprep.mubr.msk.f32.mxu1 %vm2622_vm0, %v2621_v0 }
 0x168   : > { %v775_v25 = vpop.f32.mrf.mxu0 }
 0x169   : > { %v2942_v26 = vadd.f32 %v2031_v24, %v775_v25 }
 0x16a   : > { %v2132_v27 = vpop.f32.mrf.mxu0 }
 0x16b   : > { %2139 = vmatpush3.msra.mxu1 %v2942_v26 }
 0x16c   : > { %2148 = vmatprep.subr.mxu1 %v2621_v0 }
 0x1d3   : > { %v948_v28 = vpop.permute.xlu0 %947 }
 0x1d4   : > { %2144 = vmatpush3.xpose.msk.msra.mxu0 %vm779_vm2, %v948_v28 }
 0x1d5   : > { %2153 = vmatprep.subr.mxu0 %v2621_v0 }
 0x1d7   : > { %v946_v29 = vpop.permute.xlu0 %945 }
 0x1d8   : > { %2146 = vmatmul.mubr.msk.f32.vlgmr.msra.gmra.mxu0 %vm779_vm2, %v946_v29 }
 0x1d9   : > { %2155 = vmatprep.mubr.msk.f32.mxu0 %vm2622_vm0, %v2621_v0  ;;  %2154 = vmatpush3.msra.mxu0 %v1117_v55 }
 0x1da   : > { %2163 = vmatprep.subr.mxu0 %v2621_v0 }
 0x224   : > { %v852_v31 = vpop.f32.mrf.mxu1 }
 0x225   : > { %v853_v32 = vadd.f32 %v852_v31, %v2953_v30 }
 0x226   : > { %v2137_v33 = vpop.f32.mrf.mxu1 }
 0x227   : > { %v856_v34 = vsel %vm779_vm2, %v853_v32, -inf }
 0x228   : > { %857 = vmax.xlane.f32.xlu1 %v856_v34 }
 0x298   : > { %v1019_v35 = vpop.f32.mrf.mxu0 }
 0x299   : > { %v1020_v36 = vadd.f32 %v1019_v35, %v2953_v30 }
 0x29a   : > { %v2147_v37 = vpop.f32.mrf.mxu0 }
 0x29b   : > { %v1023_v38 = vsel %vm779_vm2, %v1020_v36, -inf }
 0x29c   : > { %1024 = vmax.xlane.f32.xlu1 %v1023_v38 }
 0x2b1   : > { %v858_v39 = vpop.xlane.xlu1 %857 }
 0x2b2   : > { %v859_v40 = vsub.f32 %v853_v32, %v858_v39 }
 0x2b4   : > { %v860_v41 = vmul.f32 1.442695, %v859_v40 }
 0x2b6   : > { %2305 = vpow2.f32 %v860_v41 }
 0x2c3   : > { %v2306_v42 = vpop.eup %2305 }
 0x2c4   : > { %v862_v43 = vsel %vm779_vm2, %v2306_v42, 0.0 }
 0x2c5   : > { %863 = vadd.xlane.f32.xlu0 %v862_v43 }
 0x325   : > { %v1025_v44 = vpop.xlane.xlu1 %1024 }
 0x326   : > { %v1026_v45 = vsub.f32 %v1020_v36, %v1025_v44 }
 0x328   : > { %v1027_v46 = vmul.f32 1.442695, %v1026_v45  ;;  %v1681_v45 = vld [vmem:[#allocation11 + $0x18] sm:$0xff] }
 0x32a   : > { %2307 = vpow2.f32 %v1027_v46 }
 0x337   : > { %v2308_v47 = vpop.eup %2307 }
 0x338   : > { %v1029_v48 = vsel %vm779_vm2, %v2308_v47, 0.0 }
 0x339   : > { %1030 = vadd.xlane.f32.xlu1 %v1029_v48 }
 0x34a   : > { %1040 = vrot.lane.b32.xlu1 %v2942_v26, %s2623_s28 }
 0x34e   : > { %v864_v49 = vpop.xlane.xlu0 %863  ;;  %1266 = vrot.lane.b32.xlu1 %v2924_v20, %s2624_s30 }
 0x34f   : > { %2309 = vrcp.f32 %v864_v49 }
 0x352   : > { %1264 = vrot.lane.b32.xlu1 %v2926_v21, %s2624_s30 }
 0x35c   : > { %v2310_v50 = vpop.eup %2309 }
 0x35d   : > { %v866_v51 = vmul.f32 %v2310_v50, %v864_v49 }
 0x35f   : > { %v867_v52 = vsub.f32 2.0, %v866_v51 }
 0x361   : > { %v868_v53 = vmul.f32 %v2310_v50, %v867_v52 }
 0x363   : > { %v869_v54 = vmul.f32 %v2306_v42, %v868_v53 }
 0x365   : > { %870 = vst.msk [vmem:[%s2968_s7] sm:$0xff] %vm779_vm2, %v869_v54  ;;  %2141 = vmatmul.mubr.msk.f32.vlgmr.msra.gmra.mxu1 %vm779_vm2, %v869_v54 }
 0x366   : > { %2150 = vmatprep.mubr.msk.f32.mxu1 %vm2622_vm0, %v2621_v0 }
 0x3c2   : > { %v1031_v56 = vpop.xlane.xlu1 %1030 }
 0x3c3   : > { %2311 = vrcp.f32 %v1031_v56 }
 0x3c6   : > { %v1041_v57 = vpop.permute.xlu1 %1040 }
 0x3c7   : > { %2149 = vmatpush3.msra.mxu1 %v1041_v57 }
 0x3c8   : > { %2158 = vmatprep.subr.mxu1 %v2621_v0 }
 0x3ca   : > { %v1267_v3 = vpop.permute.xlu1 %1266 }
 0x3ce   : > { %v1265_v6 = vpop.permute.xlu1 %1264 }
 0x3d0   : > { %v2312_v58 = vpop.eup %2311 }
 0x3d1   : > { %v1033_v59 = vmul.f32 %v2312_v58, %v1031_v56 }
 0x3d3   : > { %v1034_v60 = vsub.f32 2.0, %v1033_v59 }
 0x3d5   : > { %v1035_v61 = vmul.f32 %v2312_v58, %v1034_v60 }
 0x3d7   : > { %v1036_v62 = vmul.f32 %v2308_v47, %v1035_v61 }
 0x3d9   : > { %2038 = vst.msk [vmem:[%s2968_s7 + $0x8] sm:$0xff] %vm779_vm2, %v1036_v62  ;;  %2151 = vmatmul.mubr.msk.f32.vlgmr.msra.gmra.mxu1 %vm779_vm2, %v1036_v62 }
 0x3da   : > { %2159 = vmatpush3.msra.mxu1 %v944_v63  ;;  %2160 = vmatprep.mubr.msk.f32.mxu1 %vm2622_vm0, %v2621_v0 }
 0x3db   : > { %2168 = vmatprep.subr.mxu1 %v2621_v0 }
 0x425   : > { %v940_v1 = vpop.f32.mrf.mxu1 }
 0x426   : > { %2161 = vmatmul.mubr.msk.f32.vlgmr.msra.gmra.mxu1 %vm779_vm2, %v940_v1 }
 0x427   : > { %v2142_v2 = vpop.f32.mrf.mxu1  ;;  %2170 = vmatprep.mubr.msk.f32.mxu1 %vm2622_vm0, %v2621_v0 }
 0x499   : > { %v1112_v4 = vpop.f32.mrf.mxu1 }
 0x49a   : > { %2156 = vmatmul.mubr.msk.f32.vlgmr.msra.gmra.mxu0 %vm779_vm2, %v1112_v4 }
 0x49b   : > { %2164 = vmatpush3.xpose.msk.msra.mxu0 %vm779_vm2, %v1267_v3  ;;  %v2152_v5 = vpop.f32.mrf.mxu1  ;;  %2165 = vmatprep.mubr.msk.f32.mxu0 %vm2622_vm0, %v2621_v0 }
 0x49c   : > { %2173 = vmatprep.subr.mxu0 %v2621_v0 }
 0x49e   : > { %2166 = vmatmul.mubr.msk.f32.vlgmr.msra.gmra.mxu0 %vm779_vm2, %v1265_v6 }
 0x49f   : > { %2175 = vmatprep.mubr.msk.f32.mxu0 %vm2622_vm0, %v2621_v0 }
 0x4e6   : > { %v1260_v7 = vpop.f32.mrf.mxu1 }
 0x4e8   : > { %v2162_v8 = vpop.f32.mrf.mxu1 }
 0x55a   : > { %v1187_v9 = vpop.f32.mrf.mxu0 }
 0x55c   : > { %v2157_v10 = vpop.f32.mrf.mxu0 }
 0x55e   : > { %v1338_v11 = vpop.f32.mrf.mxu0 }
 0x55f   : > { %v1339_v12 = vadd.f32 %v1338_v11, %v2953_v30 }
 0x560   : > { %v2167_v13 = vpop.f32.mrf.mxu0 }
 0x561   : > { %v1342_v14 = vsel %vm779_vm2, %v1339_v12, -inf }
 0x562   : > { %1343 = vmax.xlane.f32.xlu1 %v1342_v14 }
 0x5eb   : > { %v1344_v15 = vpop.xlane.xlu1 %1343 }
 0x5ec   : > { %v1345_v16 = vsub.f32 %v1339_v12, %v1344_v15 }
 0x5ee   : > { %v1346_v17 = vmul.f32 1.442695, %v1345_v16 }
 0x5f0   : > { %2313 = vpow2.f32 %v1346_v17 }
 0x5fd   : > { %v2314_v18 = vpop.eup %2313 }
 0x5fe   : > { %v1348_v19 = vsel %vm779_vm2, %v2314_v18, 0.0 }
 0x5ff   : > { %1349 = vadd.xlane.f32.xlu0 %v1348_v19 }
 0x615   : > { %1358 = vrot.lane.b32.xlu0 %v2942_v26, %s2624_s30 }
 0x619   : > { %1512 = vrot.lane.b32.xlu0 %v2924_v20, %s2625_s9 }
 0x61d   : > { %1510 = vrot.lane.b32.xlu0 %v2926_v21, %s2625_s9  ;;  %v1435_v21 = vld [vmem:[#allocation11 + $0x10] sm:$0xff] }
 0x61e   : > { %2174 = vmatpush3.msra.mxu0 %v1435_v21 }
 0x61f   : > { %2183 = vmatprep.subr.mxu0 %v2621_v0 }
 0x688   : > { %v1350_v22 = vpop.xlane.xlu0 %1349 }
 0x689   : > { %2315 = vrcp.f32 %v1350_v22 }
 0x68c   : > { %v1359_v23 = vpop.permute.xlu0 %1358 }
 0x68d   : > { %2169 = vmatpush3.msra.mxu1 %v1359_v23 }
 0x68e   : > { %2178 = vmatprep.subr.mxu1 %v2621_v0 }
 0x690   : > { %v1513_v29 = vpop.permute.xlu0 %1512 }
 0x694   : > { %v1511_v20 = vpop.permute.xlu0 %1510 }
 0x696   : > { %v2316_v24 = vpop.eup %2315 }
 0x697   : > { %v1352_v25 = vmul.f32 %v2316_v24, %v1350_v22 }
 0x699   : > { %v1353_v27 = vsub.f32 2.0, %v1352_v25 }
 0x69b   : > { %v1354_v28 = vmul.f32 %v2316_v24, %v1353_v27 }
 0x69d   : > { %v1355_v31 = vmul.f32 %v2314_v18, %v1354_v28 }
 0x69f   : > { %2044 = vst.msk [vmem:[%s2968_s7 + $0x10] sm:$0xff] %vm779_vm2, %v1355_v31  ;;  %2171 = vmatmul.mubr.msk.f32.vlgmr.msra.gmra.mxu1 %vm779_vm2, %v1355_v31 }
 0x6a0   : > { %2179 = vmatpush3.xpose.msk.msra.mxu1 %vm779_vm2, %v1513_v29  ;;  %2180 = vmatprep.mubr.msk.f32.mxu1 %vm2622_vm0, %v2621_v0 }
 0x6a1   : > { %2188 = vmatprep.subr.mxu1 %v2621_v0 }
 0x6a3   : > { %2181 = vmatmul.mubr.msk.f32.vlgmr.msra.gmra.mxu1 %vm779_vm2, %v1511_v20 }
 0x6a4   : > { %2190 = vmatprep.mubr.msk.f32.mxu1 %vm2622_vm0, %v2621_v0  ;;  %2189 = vmatpush3.msra.mxu1 %v1681_v45 }
 0x75f   : > { %v1430_v32 = vpop.f32.mrf.mxu1 }
 0x760   : > { %2176 = vmatmul.mubr.msk.f32.vlgmr.msra.gmra.mxu0 %vm779_vm2, %v1430_v32 }
 0x761   : > { %v2172_v33 = vpop.f32.mrf.mxu1  ;;  %2185 = vmatprep.mubr.msk.f32.mxu0 %vm2622_vm0, %v2621_v0  ;;  %v1261_v0 = vadd.f32 %v1260_v7, %v1187_v9 }
 0x763   : > { %v1584_v34 = vpop.f32.mrf.mxu1 }
 0x764   : > { %v1585_v35 = vadd.f32 %v1584_v34, %v2953_v30 }
 0x765   : > { %v2182_v36 = vpop.f32.mrf.mxu1 }
 0x766   : > { %v1588_v37 = vsel %vm779_vm2, %v1585_v35, -inf }
 0x767   : > { %1589 = vmax.xlane.f32.xlu0 %v1588_v37 }
 0x7f0   : > { %v1590_v38 = vpop.xlane.xlu0 %1589 }
 0x7f1   : > { %v1591_v39 = vsub.f32 %v1585_v35, %v1590_v38 }
 0x7f3   : > { %v1592_v40 = vmul.f32 1.442695, %v1591_v39 }
 0x7f5   : > { %2317 = vpow2.f32 %v1592_v40 }
 0x802   : > { %v2318_v41 = vpop.eup %2317 }
 0x803   : > { %v1594_v42 = vsel %vm779_vm2, %v2318_v41, 0.0 }
 0x804   : > { %1595 = vadd.xlane.f32.xlu1 %v1594_v42 }
 0x815   : > { %1604 = vrot.lane.b32.xlu1 %v2942_v26, %s2625_s9 }
 0x820   : > { %v1505_v43 = vpop.f32.mrf.mxu0 }
 0x821   : > { %v1509_v44 = vadd.f32 %v1505_v43, %v1261_v0 }
 0x822   : > { %v2177_v30 = vpop.f32.mrf.mxu0 }
 0x88d   : > { %v1596_v46 = vpop.xlane.xlu1 %1595 }
 0x88e   : > { %2319 = vrcp.f32 %v1596_v46 }
 0x891   : > { %v1605_v47 = vpop.permute.xlu1 %1604 }
 0x892   : > { %2184 = vmatpush3.msra.mxu0 %v1605_v47 }
 0x89b   : > { %v2320_v48 = vpop.eup %2319 }
 0x89c   : > { %v1598_v49 = vmul.f32 %v2320_v48, %v1596_v46 }
 0x89e   : > { %v1599_v50 = vsub.f32 2.0, %v1598_v49 }
 0x8a0   : > { %v1600_v51 = vmul.f32 %v2320_v48, %v1599_v50 }
 0x8a2   : > { %v1601_v26 = vmul.f32 %v2318_v41, %v1600_v51 }
 0x8a4   : > { %2049 = vst.msk [vmem:[%s2968_s7 + $0x18] sm:$0xff] %vm779_vm2, %v1601_v26  ;;  %2186 = vmatmul.mubr.msk.f32.vlgmr.msra.gmra.mxu0 %vm779_vm2, %v1601_v26 }
 0x964   : > { %v1676_v52 = vpop.f32.mrf.mxu0 }
 0x965   : > { %2191 = vmatmul.mubr.msk.f32.vlgmr.msra.gmra.mxu1 %vm779_vm2, %v1676_v52 }
 0x966   : > { %v2187_v53 = vpop.f32.mrf.mxu0 }
 0x967   : > { %2498 = shalt.err (!%p2495_p10)
}
 0x968   : > { %s2499_s24 = scalar_lea.hbm %s3032_s23, 512  ;;  %s2503_s18 = scalar_lea.hbm %s3163_s20, 1024 }
 0x969   : > { %p2500_p13 = scmp.ne.s32.totalorder %s3032_s23, %s2499_s24  ;;  %p2504_p1 = scmp.lt.s32.totalorder %s3032_s23, %s3163_s20 }
 0x96a   : > { %p2505_p4 = scmp.lt.s32.totalorder %s2503_s18, %s2499_s24 }
 0x96b   : > { %p2501_p5 = pnand %p2500_p13, %p3164_p11 }
 0x96c   : > { %p2506_p6 = por %p2505_p4, %p2504_p1 }
 0x96d   : > { %p2502_p2 = pneg %p2501_p5 }
 0x96f   : > { %p2507_p8 = pnand %p2506_p6, %p2502_p2 }
 0x971   : > { %2510 = shalt.err (!%p2507_p8)
}
 0x972   : > { %s2627_s7 = smov 128   ;;  %s2628_s9 = smov 8  }
 0x973   : > { %2210 = dma.vmem_to_hbm [thread:$0]  (%p3164_p11), %s3034_s8, 512, %s3032_s23, %s1771_s26, %s2627_s7, %s2627_s7, %s2628_s9  }
 0x974   : > { %s3165_s25 = sld [smem:[#allocation30_spill]]  ;;  %s2055_s4 = sshll.u32 %s2603_s12, 7 }
 0x975   : > { %s510_s15 = scalar_lea.vmem [#allocation13], %s2857_s21  ;;  %s3166_s28 = sld [smem:[#allocation31_spill]] }
 0x976   : > { %s1785_s17 = sshll.u32 %s510_s15, 4  ;;  %s1766_s18 = scalar_lea.sflag [#allocation4], %s2854_s13  ;;  %s1786_s17 = int_to_ptr.vmem [resolvable:$true] %s1785_s17 }
 0x977   : > { %s2511_s8 = scalar_lea.vmem %s1786_s17, 128  ;;  %s2629_s23 = smov [#allocation13]  }
 0x978   : > { %p2512_p12 = scmp.ne.s32.totalorder %s1786_s17, %s2511_s8  ;;  %s2515_s12 = sshll.u32 %s2629_s23, 4  ;;  %s2516_s12 = int_to_ptr.vmem [resolvable:$false] %s2515_s12 }
 0x979   : > { %s2517_s21 = scalar_lea.vmem %s2516_s12, 256  ;;  %p2518_p0 = scmp.lt.s32.totalorder %s1786_s17, %s2516_s12 }
 0x97a   : > { %v2052_v55 = vld [vmem:[%s3165_s25] ss:$0 sm:$0xff]  ;;  %p2513_p3 = pnand %p2512_p12, %p3164_p11  ;;  %p2519_p7 = scmp.lt.s32.totalorder %s2517_s21, %s2511_s8 }
 0x97b   : > { %s1783_s1 = scalar_lea.hbm %s3166_s28, %s2055_s4 }
 0x97c   : > { %p2514_p9 = pneg %p2513_p3  ;;  %p2520_p10 = por %p2519_p7, %p2518_p0 }
 0x97e   : > { %p2521_p13 = pnand %p2520_p10, %p2514_p9 }
 0xa25   : > { %v1751_v54 = vpop.f32.mrf.mxu1 }
 0xa26   : > { %v1755_v56 = vadd.f32 %v1751_v54, %v1509_v44 }
 0xa27   : > { %v2192_v57 = vpop.f32.mrf.mxu1 }
 0xa28   : > { %v1763_v58 = vadd.f32 %v2052_v55, %v1755_v56 }
 0xa2a   : > { %1764 = vst.msk [vmem:[%s510_s15] sm:$0xff] %vm533_vm1, %v1763_v58 }
 0xa2b   : > { %2524 = shalt.err (!%p2521_p13)
}
 0xa2c   : > { %s2525_s26 = scalar_lea.hbm %s1783_s1, 128  ;;  %s2529_s29 = scalar_lea.hbm %s3166_s28, 256 }
 0xa2d   : > { %p2526_p5 = scmp.ne.s32.totalorder %s1783_s1, %s2525_s26  ;;  %p2530_p4 = scmp.lt.s32.totalorder %s1783_s1, %s3166_s28 }
 0xa2e   : > { %p2531_p6 = scmp.lt.s32.totalorder %s2529_s29, %s2525_s26 }
 0xa2f   : > { %p2527_p2 = pnand %p2526_p5, %p3164_p11 }
 0xa30   : > { %p2532_p8 = por %p2531_p6, %p2530_p4 }
 0xa31   : > { %p2528_p1 = pneg %p2527_p2 }
 0xa33   : > { %p2533_p12 = pnand %p2532_p8, %p2528_p1 }
 0xa35   : > { %2536 = shalt.err (!%p2533_p12)
}
 0xa36   : > { %2209 = dma.vmem_to_hbm [thread:$0]  (%p3164_p11), %s1786_s17, 128, %s1783_s1, %s1766_s18  }
 0xa37 PF: > { %s3167_s27 = sld [smem:[#allocation23_spill]]  ;;  %p3170_p9 = scmp.ge.s32.totalorder %s2611_s14, 2 }
 0xa38   : > { %s3168_s19 = sld [smem:[#allocation25_spill]] }
 0xa3d   : > { %s1814_s25 = sand.u32 1, %s3167_s27  }
 0xa3e   : > { %p3169_p3 = scmp.ne.s32.totalorder %s3168_s19, 0  ;;  %s1815_s4 = scalar_lea.sflag [#allocation4], %s1814_s25 }
 0xa40   : > { %p2234_p0 = pnand %p3170_p9, %p3169_p3 }
 0xa42   : > { %p2235_p7 = pneg %p2234_p0 }
 0xa44   : > { %2582 = dma.done.wait (%p2235_p7), %s1815_s4, 128  }
 0xa45   : > { %2584 = vsyncadd (%p2235_p7), %s1815_s4, 4294967168  ;;  %s1824_s15 = scalar_lea.sflag [#allocation15], %s1814_s25 }
 0xa46   : > { %2586 = dma.done.wait (%p2235_p7), %s1824_s15, 512  }
 0xa47   : > { %2588 = vsyncadd (%p2235_p7), %s1824_s15, 4294966784  ;;  %s36_s14 = sadd.s32 1, %s2611_s14   ;;  %s3171_s16 = sld [smem:[#allocation27_spill]] }
 0xa48   : > { %p33_p10 = scmp.ge.s32.totalorder %s36_s14, 4   ;;  %s3172_s12 = sld [smem:[#allocation24_spill]] }
 0xa49   : > { %s3173_s13 = sld [smem:[#allocation26_spill]]  ;;  %s3174_s30 = smov %s2595_s10 }
 0xa4a   : > { %s3175_s10 = smov %s2599_s11  ;;  %35 = sbr.rel (!%p33_p10) target bundleno = 19 (0x13), region = 169 }
 0xa4d   : > { %s3176_s11 = smov %s3171_s16 }
 0xa4f   :  { %1829 = vsyncpa [#allocation3], 1 }
 0xa50   :  { %1831 = vsyncpa [#allocation3 + $0x1], 1 }
 0xa51   :  { %1832 = vsyncpa [#allocation6], 1 }
 0xa52   :  { %1834 = vsyncpa [#allocation6 + $0x1], 1 }
 0xa53   :  { %1835 = vsyncpa [#allocation9], 1 }
 0xa54   :  { %1837 = vsyncpa [#allocation9 + $0x1], 1 }
 0xa55   :  { %1838 = vsyncpa [#allocation12], 1 }
 0xa56   :  { %1839 = vsyncpa [#allocation4], 1 }
 0xa57   :  { %1841 = vsyncpa [#allocation4 + $0x1], 1 }
 0xa58   :  { %1842 = vsyncpa [#allocation15], 1 }
 0xa59   :  { %1844 = vsyncpa [#allocation15 + $0x1], 1 }

</bundles_post_ra>
